<compile_context>
chip_gen: v7x
topology: tpu7x:2x2x1
jax: 0.10.0
libtpu: 0.0.40
codegen_flags: <defaults>
</compile_context>

<pallas_src>
import functools

import jax
import jax.numpy as jnp
from jax.experimental import pallas as pl
from jax.experimental.pallas import tpu as pltpu


def _scale_norm_kernel(g_ref, x_ref, o_ref, *, inv_scale, thresh, native_mul):
    # g_ref: SMEM scalar (1,); x_ref / o_ref: VMEM tiles (row_tile, dim).
    x_raw = x_ref[...]
    xf = x_raw.astype(jnp.float32)
    sq_sum = jnp.sum(xf * xf, axis=-1, keepdims=True)          # (row_tile, 1), f32 accumulate
    # max(sqrt(s)*scale, eps) == scale * sqrt(max(s, (eps/scale)^2)); exact rsqrt (EUP slot).
    inv_norm = jax.lax.rsqrt(jnp.maximum(sq_sum, thresh))      # (row_tile, 1)
    row_scale = inv_norm * (g_ref[0] * inv_scale)              # fold g and 1/scale per row
    if native_mul:
        # bf16 VALU on v6e/v7x: keep the full-tile multiply in the input dtype.
        o_ref[...] = (x_raw * row_scale.astype(x_raw.dtype)).astype(o_ref.dtype)
    else:
        o_ref[...] = (xf * row_scale).astype(o_ref.dtype)


def _vmem_capacity_bytes():
    try:
        return int(pltpu.get_tpu_info().vmem_capacity_bytes)
    except Exception:
        return 64 * 1024 * 1024  # conservative fallback (v7x per-TC)


def _is_v5e():
    try:
        kind = jax.devices()[0].device_kind.lower()
    except Exception:
        return False
    return ("v5 lite" in kind) or ("v5e" in kind) or ("v5litepod" in kind)


def _pick_row_tile(rows, dim, itemsize, vmem_bytes):
    # Full sublane occupancy per dtype (f32:8, bf16:16, int8/fp8:32).
    sublane = {4: 8, 2: 16, 1: 32}.get(itemsize, 8)
    # Generation-aware block target: ~VMEM/12 so 6*block (limit) == VMEM/2.
    #   v7x (64 MiB/TC) -> ~5.3 MiB blocks; v5e/v6e (128 MiB) -> ~10.7 MiB blocks.
    target_block_bytes = max(4 * 1024 * 1024, vmem_bytes // 12)
    rt = (target_block_bytes // max(dim * itemsize, 1)) // sublane * sublane
    rt = max(rt, sublane)
    # No hard row-count cap — only total block bytes matter (review feedback).
    # No point tiling beyond the (sublane-rounded) row count.
    rt = min(rt, pl.cdiv(rows, sublane) * sublane)
    return int(rt)


def scale_norm(x, g, *, eps=1e-5, row_tile=None):
    """ScaleNorm over the last dimension of x.

    x: [..., dim]  (any leading dims)
    g: scalar parameter, shape (1,), float32
    """
    dim = x.shape[-1]
    inv_scale = float(dim) ** 0.5                       # 1 / scale
    thresh = float(eps) * float(eps) * float(dim)       # (eps / scale)**2, python double

    orig_shape = x.shape
    x2d = x.reshape(-1, dim)                            # collapse leading dims (free bitcast)
    rows = x2d.shape[0]
    itemsize = jnp.dtype(x.dtype).itemsize

    vmem_bytes = _vmem_capacity_bytes()
    if row_tile is None:
        row_tile = _pick_row_tile(rows, dim, itemsize, vmem_bytes)

    # Ragged rows handled by Pallas boundary blocks (masked stores); no host pad/slice.
    num_blocks = pl.cdiv(rows, row_tile)

    # Keep f32 output math on v5e (no bf16 VALU); native-dtype multiply elsewhere.
    native_mul = (itemsize < 4) and not _is_v5e()

    kernel = functools.partial(
        _scale_norm_kernel, inv_scale=inv_scale, thresh=thresh, native_mul=native_mul
    )

    block_bytes = row_tile * dim * itemsize
    # 2 arrays x 2 double-buffers = 4*block in flight; 6*block gives headroom.
    # Capped at half the physical per-TC VMEM (generation-aware).
    vmem_limit = int(max(16 * 1024 * 1024, min(6 * block_bytes, vmem_bytes // 2)))

    # TODO(synk): for dim < 128 (or not a multiple of 128), output stores are masked
    # partial vst; packing k hidden vectors per 128-lane row would make them lane-dense
    # (biggest lever on v5e's single vst slot). No-op for typical transformer dims.
    out2d = pl.pallas_call(
        kernel,
        out_shape=jax.ShapeDtypeStruct((rows, dim), x.dtype),
        grid_spec=pltpu.PrefetchScalarGridSpec(
            num_scalar_prefetch=0,
            grid=(num_blocks,),
            in_specs=[
                pl.BlockSpec(memory_space=pltpu.MemorySpace.SMEM),   # g (scalar)
                pl.BlockSpec((row_tile, dim), lambda i: (i, 0)),     # x tile
            ],
            out_specs=pl.BlockSpec((row_tile, dim), lambda i: (i, 0)),
        ),
        compiler_params=pltpu.CompilerParams(
            dimension_semantics=("parallel",),
            vmem_limit_bytes=vmem_limit,
        ),
        cost_estimate=pl.CostEstimate(
            flops=3 * rows * dim,
            transcendentals=rows,
            bytes_accessed=2 * rows * dim * itemsize,
        ),
    )(g, x2d)

    return out2d.reshape(orig_shape)


def scale_norm_ref(x, g, eps=1e-5):
    """Pure-JAX reference matching the PyTorch forward."""
    dim = x.shape[-1]
    xf = x.astype(jnp.float32)
    norm = jnp.linalg.norm(xf, axis=-1, keepdims=True) * (dim ** -0.5)
    return (xf / jnp.maximum(norm, eps) * g).astype(x.dtype)


if __name__ == "__main__":
    key = jax.random.PRNGKey(0)

    # Deterministic parameter init matching nn.Parameter(torch.ones(1)).
    g = jnp.ones((1,), dtype=jnp.float32)

    # Case 1: standard small shape, f32 (rows divisible by tile).
    batch, seq, hidden = 2, 8, 32
    x = jax.random.normal(key, (batch, seq, hidden), dtype=jnp.float32)
    out = jax.block_until_ready(scale_norm(x, g, eps=1e-5))
    ref = scale_norm_ref(x, g, eps=1e-5)
    assert out.shape == x.shape
    assert jnp.allclose(out, ref, atol=1e-5, rtol=1e-5), "mismatch vs reference (case 1)"

    # Case 2: ragged row count (exercises the cdiv-grid boundary-block path, no host pad).
    x2 = jax.random.normal(jax.random.PRNGKey(1), (3, 5, 32), dtype=jnp.float32)
    out2 = jax.block_until_ready(scale_norm(x2, g, eps=1e-5))
    ref2 = scale_norm_ref(x2, g, eps=1e-5)
    assert out2.shape == x2.shape
    assert jnp.allclose(out2, ref2, atol=1e-5, rtol=1e-5), "mismatch vs reference (case 2)"

    # Case 3: bf16 path (f32 square-sum accumulate, native-dtype output multiply).
    x3 = jax.random.normal(jax.random.PRNGKey(2), (2, 8, 32), dtype=jnp.float32).astype(
        jnp.bfloat16
    )
    out3 = jax.block_until_ready(scale_norm(x3, g, eps=1e-5))
    ref3 = scale_norm_ref(x3, g, eps=1e-5)
    assert out3.shape == x3.shape
    assert jnp.allclose(
        out3.astype(jnp.float32), ref3.astype(jnp.float32), atol=3e-2, rtol=3e-2
    ), "mismatch vs reference (case 3, bf16)"

    print("KERNEL_OK")
</pallas_src>

<mosaic_0001>
module attributes {stable_mosaic.version = 11 : i64} {
  func.func @_scale_norm_kernel(%arg0: i32, %arg1: memref<1xf32, #tpu.memory_space<smem>>, %arg2: memref<16x32xf32, #tpu.memory_space<vmem>>, %arg3: memref<16x32xf32, #tpu.memory_space<vmem>>) attributes {dimension_semantics = [#tpu.dimension_semantics<parallel>], iteration_bounds = array<i64: 1>, scalar_prefetch = 0 : i64, scratch_operands = 0 : i64, tpu.core_type = #tpu.core_type<tc>, window_params = [{transform_indices = @transform_0, window_bounds = array<i64: 1>}, {transform_indices = @transform_1, window_bounds = array<i64: 16, 32>}, {transform_indices = @transform_2, window_bounds = array<i64: 16, 32>}]} {
    %c0 = arith.constant 0 : index
    %c0_0 = arith.constant 0 : index
    %0 = vector.load %arg2[%c0, %c0_0] : memref<16x32xf32, #tpu.memory_space<vmem>>, vector<16x32xf32>
    %1 = arith.mulf %0, %0 : vector<16x32xf32>
    %cst = arith.constant dense<0.000000e+00> : vector<16xf32>
    %2 = vector.multi_reduction <add>, %1, %cst [1] : vector<16x32xf32> to vector<16xf32>
    %3 = vector.shape_cast %2 : vector<16xf32> to vector<16x1xf32>
    %cst_1 = arith.constant 3.200000e-09 : f32
    %4 = vector.broadcast %cst_1 : f32 to vector<16x1xf32>
    %5 = arith.maximumf %3, %4 : vector<16x1xf32>
    %6 = math.rsqrt %5 : vector<16x1xf32>
    %c0_2 = arith.constant 0 : index
    %7 = memref.load %arg1[%c0_2] : memref<1xf32, #tpu.memory_space<smem>>
    %cst_3 = arith.constant 5.65685415 : f32
    %8 = arith.mulf %7, %cst_3 : f32
    %9 = vector.broadcast %8 : f32 to vector<16x1xf32>
    %10 = arith.mulf %6, %9 : vector<16x1xf32>
    %11 = vector.broadcast %10 : vector<16x1xf32> to vector<16x32xf32>
    %12 = arith.mulf %0, %11 : vector<16x32xf32>
    %c0_4 = arith.constant 0 : index
    %c0_5 = arith.constant 0 : index
    %13 = vector.load %arg3[%c0_4, %c0_5] : memref<16x32xf32, #tpu.memory_space<vmem>>, vector<16x32xf32>
    tpu.vector_store %arg3[%c0_4, %c0_5], %12 {strides = array<i32>} : memref<16x32xf32, #tpu.memory_space<vmem>>, vector<16x32xf32>,
    return
  }
  func.func @transform_0(%arg0: i32) -> i32 {
    %c0_i32 = arith.constant 0 : i32
    %c0_i32_0 = arith.constant 0 : i32
    return %c0_i32 : i32
  }
  func.func @transform_1(%arg0: i32) -> (i32, i32) {
    %c0_i32 = arith.constant 0 : i32
    %c0_i32_0 = arith.constant 0 : i32
    return %arg0, %c0_i32 : i32, i32
  }
  func.func @transform_2(%arg0: i32) -> (i32, i32) {
    %c0_i32 = arith.constant 0 : i32
    %c0_i32_0 = arith.constant 0 : i32
    return %arg0, %c0_i32 : i32, i32
  }
}

</mosaic_0001>

<bundles_post_ra>
// kernel: tpu_custom_call.1
= control target key start
LH: loop header
LB: loop body
LE: loop exit
PB: predicated region body
PF: predicated region fallthrough
CT: control target
= control target key end

     0   :  { %8 = vsyncpa [#allocation4], 0  ;;  %s180_s0 = inlined_call_operand.<no memory space> [shape: f32[1], index: 0, kind: input, shape index: {}]   ;;  %s181_s1 = inlined_call_operand.hbm [shape: f32[16,32], index: 1, kind: input, shape index: {}]   ;;  %s182_s2 = inlined_call_operand.hbm [shape: f32[16,32], index: 2, kind: output, shape index: {}]  }
   0x1   :  { %9 = vsyncpa [#allocation5], 0  ;;  %s124_s9 = smov [#allocation3]   ;;  %s76_s13 = scalar_lea.hbm %s181_s1, 256 }
   0x2   :  { %s17_s10 = sshll.u32 %s124_s9, 4  ;;  %p77_p0 = scmp.ne.s32.totalorder %s181_s1, %s76_s13  ;;  %s18_s10 = int_to_ptr.vmem [resolvable:$true] %s17_s10 }
   0x3   :  { %p80_p1 = scmp.lt.u32.totalorder %s76_s13, %s181_s1 }
   0x5   :  { %p82_p2 = pnand %p80_p1, %p77_p0 }
   0x7   :  { %85 = shalt.err (!%p82_p2)
}
   0x8   :  { %s86_s18 = scalar_lea.vmem %s18_s10, 256  ;;  %p91_p4 = scmp.lt.s32.totalorder %s18_s10, %s18_s10 }
   0x9   :  { %p87_p3 = scmp.ne.s32.totalorder %s18_s10, %s86_s18  ;;  %p92_p5 = scmp.lt.s32.totalorder %s86_s18, %s86_s18 }
   0xb   :  { %p93_p6 = por %p92_p5, %p91_p4 }
   0xd   :  { %p94_p7 = pnand %p93_p6, %p87_p3 }
   0xf   :  { %97 = shalt.err (!%p94_p7)
}
  0x10   :  { %s125_s19 = smov 128   ;;  %s126_s20 = smov 8  }
  0x11   :  { %23 = dma.hbm_to_vmem [thread:$0]  %s181_s1, 256, %s18_s10, [#allocation4], %s125_s19, %s125_s19, %s126_s20  }
  0x12   :  { %120 = dma.done.wait [#allocation4], 256  }
  0x13   :  { %121 = vsyncadd [#allocation4], 4294967040  ;;  %v27_v0 = vld [vmem:[#allocation3] sm:$0xff]  ;;  %vm31_vm0 = vcmask 261120   ;;  %v28_v1 = vld [vmem:[#allocation3 + $0x8] sm:$0xff]  ;;  %s127_s25 = smov [#allocation6]  }
  0x14   :  { %v29_v2 = vmul.f32 %v27_v0, %v27_v0  ;;  %v30_v3 = vmul.f32 %v28_v1, %v28_v1  ;;  %s43_s24 = smul.f32 5.656854, %s180_s0  ;;  %s56_s26 = sshll.u32 %s127_s25, 4  ;;  %s57_s26 = int_to_ptr.vmem [resolvable:$true] %s56_s26 }
  0x15   :  { %s98_s27 = scalar_lea.vmem %s57_s26, 256  ;;  %p103_p9 = scmp.lt.s32.totalorder %s57_s26, %s57_s26 }
  0x16   :  { %v32_v4 = vsel %vm31_vm0, %v29_v2, 0.0  ;;  %v35_v5 = vsel %vm31_vm0, %v30_v3, 0.0  ;;  %v44_v10 = vstv %s43_s24  ;;  %p99_p8 = scmp.ne.s32.totalorder %s57_s26, %s98_s27  ;;  %p104_p10 = scmp.lt.s32.totalorder %s98_s27, %s98_s27 }
  0x17   :  { %33 = vadd.xlane.f32.xlu0 %v32_v4 }
  0x18   :  { %p105_p11 = por %p104_p10, %p103_p9 }
  0x1a   :  { %p106_p12 = pnand %p105_p11, %p99_p8 }
  0x1b   :  { %36 = vadd.xlane.f32.xlu0 %v35_v5 }
  0xa4   :  { %v34_v6 = vpop.xlane.xlu0 %33 }
  0xa5   :  { %v38_v7 = vmax.f32 %v34_v6, 3.2e-09 }
  0xa7   :  { %72 = vrsqrt.f32 %v38_v7 }
  0xa8   :  { %v37_v8 = vpop.xlane.xlu0 %36 }
  0xa9   :  { %v39_v9 = vmax.f32 %v37_v8, 3.2e-09 }
  0xab   :  { %74 = vrsqrt.f32 %v39_v9 }
  0xb1   :  { %v73_v11 = vpop.eup %72 }
  0xb2   :  { %v45_v12 = vmul.f32 %v73_v11, %v44_v10 }
  0xb4   :  { %v47_v13 = vmul.f32 %v45_v12, %v27_v0 }
  0xb5   :  { %v75_v14 = vpop.eup %74 }
  0xb6   :  { %v46_v15 = vmul.f32 %v75_v14, %v44_v10  ;;  %49 = vst.msk [vmem:[#allocation6] sm:$0xff] %vm31_vm0, %v47_v13 }
  0xb8   :  { %v48_v16 = vmul.f32 %v46_v15, %v28_v1 }
  0xba   :  { %50 = vst.msk [vmem:[#allocation6 + $0x8] sm:$0xff] %vm31_vm0, %v48_v16 }
  0xbb   :  { %109 = shalt.err (!%p106_p12)
}
  0xbc   :  { %s110_s29 = scalar_lea.hbm %s182_s2, 256 }
  0xbd   :  { %p111_p13 = scmp.ne.s32.totalorder %s182_s2, %s110_s29  ;;  %p114_p0 = scmp.lt.u32.totalorder %s110_s29, %s182_s2 }
  0xbf   :  { %p116_p1 = pnand %p114_p0, %p111_p13 }
  0xc1   :  { %119 = shalt.err (!%p116_p1)
}
  0xc2   :  { %62 = dma.vmem_to_hbm [thread:$0]  %s57_s26, 256, %s182_s2, [#allocation5], %s125_s19, %s125_s19, %s126_s20  }
  0xc3   :  { %122 = dma.done.wait [#allocation5], 256  }
  0xc4   :  { %123 = vsyncadd [#allocation5], 4294967040 }
  0xc5   :  { %66 = vsyncpa [#allocation4], 1 }
  0xc6   :  { %67 = vsyncpa [#allocation5], 1 }

</bundles_post_ra>
